<compile_context>
chip_gen: v6e
topology: v6e:2x2x1
jax: 0.10.0
libtpu: 0.0.40
codegen_flags: <defaults>
</compile_context>

<pallas_src>
import functools

import jax
import jax.numpy as jnp
from jax import lax
from jax.experimental import pallas as pl
from jax.experimental.pallas import tpu as pltpu


def _round_up(x: int, m: int) -> int:
    return ((x + m - 1) // m) * m


def _vmem_capacity_bytes() -> int:
    """Physical VMEM per TensorCore; conservative (v7x) fallback."""
    try:
        return int(pltpu.get_tpu_info().vmem_capacity_bytes)
    except Exception:
        return 64 * 1024 * 1024


def _ce_label_smooth_kernel(logits_ref, targets_ref, out_ref, *,
                            num_classes: int, epsilon: float,
                            n_total: int, tile_n: int):
    x = logits_ref[...].astype(jnp.float32)        # (tile_n, C), upcast in-register
    tgt = targets_ref[...]                         # (tile_n, 1) int32

    # Single tile-wide subtract; every downstream term reuses xm (rowmax cancels
    # algebraically, so no further per-element work involving m is needed).
    m = jnp.max(x, axis=1, keepdims=True)                          # (tile_n, 1)
    xm = x - m                                                     # (tile_n, C)

    log_se = jnp.log(jnp.sum(jnp.exp(xm), axis=1, keepdims=True))  # (tile_n, 1)
    sum_xm = jnp.sum(xm, axis=1, keepdims=True)                    # (tile_n, 1)

    # Target logit (shifted) via masked select + row reduce; no one_hot tensor.
    col = lax.broadcasted_iota(jnp.int32, xm.shape, 1)
    tgt_xm = jnp.sum(jnp.where(col == tgt, xm, 0.0),
                     axis=1, keepdims=True)                        # (tile_n, 1)

    # loss_n = log_se - (1-eps)*xm[t_n] - (eps/C)*sum_xm
    row_loss = (log_se
                - (1.0 - epsilon) * tgt_xm
                - (epsilon / num_classes) * sum_xm)                # (tile_n, 1)

    if n_total % tile_n != 0:
        # Ragged last tile: mask only the (tile_n, 1) per-row loss. Reductions
        # are strictly per-row and jnp.where is a true select, so garbage from
        # padded rows cannot leak into valid rows; padded output rows are also
        # dropped by Pallas on writeback.
        i = pl.program_id(0)
        ridx = i * tile_n + lax.broadcasted_iota(jnp.int32, (tile_n, 1), 0)
        row_loss = jnp.where(ridx < n_total, row_loss, 0.0)

    out_ref[...] = row_loss


def cross_entropy_label_smooth(logits: jax.Array,
                               targets: jax.Array,
                               *, num_classes: int, epsilon: float,
                               tile_n: int | None = None) -> jax.Array:
    """Pallas TPU implementation of CrossEntropyLabelSmooth.forward.

    logits:  (N, C) float array (f32 or bf16; feed bf16 from the producer to
             halve HBM traffic — the kernel upcasts in-register)
    targets: (N,)   int   array of class indices in [0, C)
    returns: scalar f32 loss
    """
    n, c = logits.shape
    assert c == num_classes
    targets_2d = targets.astype(jnp.int32).reshape(n, 1)

    itemsize = jnp.dtype(logits.dtype).itemsize
    c_pad = _round_up(c, 128)                      # lane-padded width in VMEM

    vmem_cap = _vmem_capacity_bytes()
    if vmem_cap >= 100 * 1024 * 1024:              # v5e / v6e (128 MiB physical)
        vmem_limit = 64 * 1024 * 1024
        block_budget = 40 * 1024 * 1024
    else:                                          # v7x (64 MiB physical)
        vmem_limit = 48 * 1024 * 1024
        block_budget = 30 * 1024 * 1024

    # Per-row VMEM cost: 2x double-buffered logits block (input dtype, lane
    # padded) + 2x (row,1) target block + 2x (row,1) output block (each lane
    # padded to 128) + ~4 tile-sized f32 temporaries (upcast x, xm, exp, mask).
    per_row = (2 * c_pad * itemsize
               + 2 * 128 * 4
               + 2 * 128 * 4
               + 4 * c_pad * 4)

    if tile_n is None:
        tile_n = max(8, (block_budget // per_row) // 8 * 8)   # byte-sized, no row cap
    tile_n = int(min(int(tile_n), _round_up(n, 8)))
    if tile_n % 8 != 0:
        tile_n = _round_up(tile_n, 8)

    grid = pl.cdiv(n, tile_n)

    kernel = functools.partial(_ce_label_smooth_kernel,
                               num_classes=num_classes,
                               epsilon=float(epsilon),
                               n_total=n,
                               tile_n=tile_n)

    cost = pl.CostEstimate(
        flops=int(6 * n * c),
        transcendentals=int(n * c),
        bytes_accessed=int(n * c * itemsize + 8 * n))

    row_losses = pl.pallas_call(
        kernel,
        out_shape=jax.ShapeDtypeStruct((n, 1), jnp.float32),
        grid=(grid,),
        in_specs=[
            pl.BlockSpec((tile_n, c), lambda i: (i, 0)),   # streamed logits rows
            pl.BlockSpec((tile_n, 1), lambda i: (i, 0)),   # per-row class indices
        ],
        out_specs=pl.BlockSpec((tile_n, 1), lambda i: (i, 0)),  # per-row losses
        compiler_params=pltpu.CompilerParams(
            dimension_semantics=("parallel",),             # independent row tiles
            vmem_limit_bytes=vmem_limit),
        cost_estimate=cost,
    )(logits, targets_2d)

    # Final tiny reduction (N scalars) + global-N mean in XLA.
    return jnp.sum(row_losses) * (1.0 / n)


def _reference(logits, targets, num_classes, epsilon):
    log_probs = jax.nn.log_softmax(logits.astype(jnp.float32), axis=1)
    one_hot = jax.nn.one_hot(targets, num_classes, dtype=jnp.float32)
    smooth = (1.0 - epsilon) * one_hot + epsilon / num_classes
    return jnp.sum(jnp.mean(-smooth * log_probs, axis=0))


if __name__ == "__main__":
    num_classes = 32
    epsilon = 0.1

    key = jax.random.PRNGKey(0)
    k1, k2, k3, k4 = jax.random.split(key, 4)

    # Case 1: batch=16, forced tile_n=8 -> 2 parallel grid steps.
    logits_a = jax.random.normal(k1, (16, num_classes), dtype=jnp.float32)
    targets_a = jax.random.randint(k2, (16,), 0, num_classes, dtype=jnp.int32)
    loss_a = cross_entropy_label_smooth(logits_a, targets_a,
                                        num_classes=num_classes, epsilon=epsilon,
                                        tile_n=8)
    jax.block_until_ready(loss_a)
    ref_a = _reference(logits_a, targets_a, num_classes, epsilon)
    assert jnp.allclose(loss_a, ref_a, atol=1e-5, rtol=1e-5), (loss_a, ref_a)

    # Case 2: batch=12, tile_n=8 -> ragged last tile (exercises row masking).
    logits_b = jax.random.normal(k3, (12, num_classes), dtype=jnp.float32)
    targets_b = jax.random.randint(k4, (12,), 0, num_classes, dtype=jnp.int32)
    loss_b = cross_entropy_label_smooth(logits_b, targets_b,
                                        num_classes=num_classes, epsilon=epsilon,
                                        tile_n=8)
    jax.block_until_ready(loss_b)
    ref_b = _reference(logits_b, targets_b, num_classes, epsilon)
    assert jnp.allclose(loss_b, ref_b, atol=1e-5, rtol=1e-5), (loss_b, ref_b)

    # Case 3: auto tile sizing (generation-aware, byte-budgeted, clamps to N).
    loss_c = cross_entropy_label_smooth(logits_a, targets_a,
                                        num_classes=num_classes, epsilon=epsilon)
    jax.block_until_ready(loss_c)
    assert jnp.allclose(loss_c, ref_a, atol=1e-5, rtol=1e-5), (loss_c, ref_a)

    # Case 4: bf16 logits from the producer (kernel upcasts in-register).
    logits_d = logits_a.astype(jnp.bfloat16)
    loss_d = cross_entropy_label_smooth(logits_d, targets_a,
                                        num_classes=num_classes, epsilon=epsilon)
    jax.block_until_ready(loss_d)
    ref_d = _reference(logits_d, targets_a, num_classes, epsilon)
    assert jnp.allclose(loss_d, ref_d, atol=1e-4, rtol=1e-4), (loss_d, ref_d)

    print("KERNEL_OK")
</pallas_src>

<mosaic_0001>
module attributes {stable_mosaic.version = 11 : i64} {
  func.func @_ce_label_smooth_kernel(%arg0: i32, %arg1: memref<8x32xf32, #tpu.memory_space<vmem>>, %arg2: memref<8x1xi32, #tpu.memory_space<vmem>>, %arg3: memref<8x1xf32, #tpu.memory_space<vmem>>) attributes {dimension_semantics = [#tpu.dimension_semantics<parallel>], iteration_bounds = array<i64: 2>, scalar_prefetch = 0 : i64, scratch_operands = 0 : i64, tpu.core_type = #tpu.core_type<tc>, window_params = [{transform_indices = @transform_0, window_bounds = array<i64: 8, 32>}, {transform_indices = @transform_1, window_bounds = array<i64: 8, 1>}, {transform_indices = @transform_2, window_bounds = array<i64: 8, 1>}]} {
    %c0 = arith.constant 0 : index
    %c0_0 = arith.constant 0 : index
    %0 = vector.load %arg1[%c0, %c0_0] : memref<8x32xf32, #tpu.memory_space<vmem>>, vector<8x32xf32>
    %c0_1 = arith.constant 0 : index
    %c0_2 = arith.constant 0 : index
    %1 = vector.load %arg2[%c0_1, %c0_2] : memref<8x1xi32, #tpu.memory_space<vmem>>, vector<8x1xi32>
    %cst = arith.constant dense<0xFF800000> : vector<8xf32>
    %2 = vector.multi_reduction <maximumf>, %0, %cst [1] : vector<8x32xf32> to vector<8xf32>
    %3 = vector.shape_cast %2 : vector<8xf32> to vector<8x1xf32>
    %4 = vector.broadcast %3 : vector<8x1xf32> to vector<8x32xf32>
    %5 = arith.subf %0, %4 : vector<8x32xf32>
    %6 = math.exp %5 : vector<8x32xf32>
    %cst_3 = arith.constant dense<0.000000e+00> : vector<8xf32>
    %7 = vector.multi_reduction <add>, %6, %cst_3 [1] : vector<8x32xf32> to vector<8xf32>
    %8 = vector.shape_cast %7 : vector<8xf32> to vector<8x1xf32>
    %9 = math.log %8 : vector<8x1xf32>
    %cst_4 = arith.constant dense<0.000000e+00> : vector<8xf32>
    %10 = vector.multi_reduction <add>, %5, %cst_4 [1] : vector<8x32xf32> to vector<8xf32>
    %11 = vector.shape_cast %10 : vector<8xf32> to vector<8x1xf32>
    %12 = tpu.iota {dimensions = array<i32: 1>} : vector<8x32xi32>
    %13 = vector.broadcast %1 : vector<8x1xi32> to vector<8x32xi32>
    %14 = arith.cmpi eq, %12, %13 : vector<8x32xi32>
    %cst_5 = arith.constant 0.000000e+00 : f32
    %15 = vector.broadcast %cst_5 : f32 to vector<8x32xf32>
    %16 = arith.select %14, %5, %15 : vector<8x32xi1>, vector<8x32xf32>
    %cst_6 = arith.constant dense<0.000000e+00> : vector<8xf32>
    %17 = vector.multi_reduction <add>, %16, %cst_6 [1] : vector<8x32xf32> to vector<8xf32>
    %18 = vector.shape_cast %17 : vector<8xf32> to vector<8x1xf32>
    %cst_7 = arith.constant 0.899999976 : f32
    %19 = vector.broadcast %cst_7 : f32 to vector<8x1xf32>
    %20 = arith.mulf %19, %18 : vector<8x1xf32>
    %21 = arith.subf %9, %20 : vector<8x1xf32>
    %cst_8 = arith.constant 3.125000e-03 : f32
    %22 = vector.broadcast %cst_8 : f32 to vector<8x1xf32>
    %23 = arith.mulf %22, %11 : vector<8x1xf32>
    %24 = arith.subf %21, %23 : vector<8x1xf32>
    %c0_9 = arith.constant 0 : index
    %c0_10 = arith.constant 0 : index
    %25 = vector.load %arg3[%c0_9, %c0_10] : memref<8x1xf32, #tpu.memory_space<vmem>>, vector<8x1xf32>
    tpu.vector_store %arg3[%c0_9, %c0_10], %24 {strides = array<i32>} : memref<8x1xf32, #tpu.memory_space<vmem>>, vector<8x1xf32>,
    return
  }
  func.func @transform_0(%arg0: i32) -> (i32, i32) {
    %c0_i32 = arith.constant 0 : i32
    %c0_i32_0 = arith.constant 0 : i32
    return %arg0, %c0_i32 : i32, i32
  }
  func.func @transform_1(%arg0: i32) -> (i32, i32) {
    %c0_i32 = arith.constant 0 : i32
    %c0_i32_0 = arith.constant 0 : i32
    return %arg0, %c0_i32 : i32, i32
  }
  func.func @transform_2(%arg0: i32) -> (i32, i32) {
    %c0_i32 = arith.constant 0 : i32
    %c0_i32_0 = arith.constant 0 : i32
    return %arg0, %c0_i32 : i32, i32
  }
}

</mosaic_0001>

<bundles_post_ra>
// kernel: tpu_custom_call.1
= control target key start
LH: loop header
LB: loop body
LE: loop exit
PB: predicated region body
PF: predicated region fallthrough
CT: control target
= control target key end

     0   :  { %s302_s9 = smov 0   ;;  %s331_s0 = inlined_call_operand.vmem [shape: f32[16,32], index: 0, kind: input, shape index: {}]   ;;  %s332_s1 = inlined_call_operand.vmem [shape: s32[16,1], index: 1, kind: input, shape index: {}]   ;;  %s333_s2 = inlined_call_operand.vmem [shape: f32[16,1], index: 2, kind: output, shape index: {}]  }
   0x1 LB: > { %s254_s10 = sadd.s32 4294967295, %s284_s9   ;;  %p258_p0 = scmp.ge.s32.totalorder %s284_s9, 1  ;;  %s284_s9 = sphi %s302_s9, %s12_s9  }
   0x2   : > { %p120_p1 = scmp.lt.s32.totalorder %s284_s9, 3 }
   0x4   : > { %p121_p2 = pnand %p258_p0, %p120_p1 }
   0x5   : > { %p144_p3 = scmp.lt.s32.totalorder (!%p121_p2), %s254_s10, 1 }
   0x6   : > { %124 = sbr.rel (%p121_p2) target bundleno = 332 (0x14c), region = 28 }
   0xb   : > { %v286_v0 = vmov 0   ;;  %s335_s10 = smov (!%p144_p3, %s254_s10), 1  ;;  %vm158_vm0 = vcmask 261120   ;;  %v173_v7 = vlaneseq  ;;  %vm187_vm2 = vcmask 7168  }
   0xc   : > { %273 = vset.pattern.permute.xlu0 %v286_v0  ;;  %s310_s11 = sshll.u32 %s335_s10, 3 }
   0xd   : > { %s147_s14 = scalar_lea.vmem %s331_s0, %s310_s11  ;;  %s151_s17 = scalar_lea.vmem %s332_s1, %s310_s11  ;;  %v174_v8 = vand.u32 127, %v173_v7 }
   0xe   : > { %v156_v1 = vld [vmem:[%s147_s14] sm:$0xff]  ;;  %s155_s20 = scalar_lea.vmem %s333_s2, %s310_s11 }
   0xf   : > { %v159_v2 = vsel %vm158_vm0, %v156_v1, -inf  ;;  %v157_v3 = vld [vmem:[%s151_s17] sm:$0xff] }
  0x10   : > { %160 = vmax.xlane.f32.xlu0 %v159_v2 }
  0x26   : > { %176 = vperm.xlu0 %273, %v157_v3  }
  0x99   : > { %v161_v4 = vpop.xlane.xlu0 %160 }
  0x9a   : > { %v162_v5 = vsub.f32 %v156_v1, %v161_v4 }
  0x9c   : > { %v163_v6 = vmul.f32 1.442695, %v162_v5  ;;  %v170_v14 = vsel %vm158_vm0, %v162_v5, 0.0 }
  0x9e   : > { %274 = vpow2.f32 %v163_v6 }
  0xa1   : > { %v177_v9 = vpop.permute.xlu0 %176 }
  0xa2   : > { %vm178_vm1 = vcmp.eq.s32.totalorder %v174_v8, %v177_v9 }
  0xa3   : > { %v179_v12 = vsel %vm178_vm1, %v162_v5, 0.0 }
  0xa4   : > { %v180_v13 = vsel %vm158_vm0, %v179_v12, 0.0 }
  0xab   : > { %v275_v10 = vpop.eup %274 }
  0xac   : > { %v165_v11 = vsel %vm158_vm0, %v275_v10, 0.0 }
  0xad   : > { %166 = vadd.xlane.f32.xlu1 %v165_v11 }
  0xb1   : > { %181 = vadd.xlane.f32.xlu1 %v180_v13 }
  0xb5   : > { %171 = vadd.xlane.f32.xlu1 %v170_v14 }
 0x136   : > { %v167_v15 = vpop.xlane.xlu1 %166 }
 0x137   : > { %276 = vlog2.f32 %v167_v15 }
 0x13a   : > { %v182_v16 = vpop.xlane.xlu1 %181 }
 0x13b   : > { %v183_v20 = vmul.f32 0.9, %v182_v16 }
 0x13e   : > { %v172_v18 = vpop.xlane.xlu1 %171 }
 0x13f   : > { %v185_v22 = vmul.f32 0.003125, %v172_v18 }
 0x144   : > { %v277_v17 = vpop.eup %276 }
 0x145   : > { %v169_v19 = vmul.f32 0.6931472, %v277_v17 }
 0x147   : > { %v184_v21 = vsub.f32 %v169_v19, %v183_v20 }
 0x149   : > { %v186_v23 = vsub.f32 %v184_v21, %v185_v22 }
 0x14b   : > { %188 = vst.msk [vmem:[%s155_s20] sm:$0xff] %vm187_vm2, %v186_v23 }
 0x14c PF: > { %s12_s9 = sadd.s32 1, %s284_s9  }
 0x14d   : > { %p9_p4 = scmp.ge.s32.totalorder %s12_s9, 4  }
 0x14f   :  { %11 = sbr.rel (!%p9_p4) target bundleno = 1 (0x1), region = 61 }

</bundles_post_ra>
